<compile_context>
chip_gen: v6e
topology: v6e:2x2x1
jax: 0.10.0
libtpu: 0.0.40
codegen_flags: <defaults>
</compile_context>

<pallas_src>
import functools

import jax
import jax.numpy as jnp
from jax.experimental import pallas as pl
from jax.experimental.pallas import tpu as pltpu


# ----------------------------------------------------------------------------
# Padding / tiling helpers
# ----------------------------------------------------------------------------
def _round_up(x, m):
    return ((x + m - 1) // m) * m


def _pick_tile(dim, max_tile, align):
    """Pick a tile size (multiple of `align`, <= max_tile) and the padded dim."""
    tile = min(max_tile, _round_up(dim, align))
    padded = _round_up(dim, tile)
    return tile, padded


def _pad2d(a, rows, cols):
    r, c = a.shape
    return jnp.pad(a, ((0, rows - r), (0, cols - c)))


# ----------------------------------------------------------------------------
# Kernel 1: tiled  out = act(x @ w + b)
# grid = (M/TM, N/TN, K/TK), K (reduction) last, f32 accumulator in VMEM.
# ----------------------------------------------------------------------------
def _linear_kernel(x_ref, w_ref, b_ref, o_ref, acc_ref, *, activation):
    k = pl.program_id(2)

    @pl.when(k == 0)
    def _():
        acc_ref[...] = jnp.zeros_like(acc_ref)

    acc_ref[...] += jnp.dot(
        x_ref[...], w_ref[...], preferred_element_type=jnp.float32
    )

    @pl.when(k == pl.num_programs(2) - 1)
    def _():
        y = acc_ref[...] + b_ref[...]
        if activation == "tanh":
            y = jnp.tanh(y)
        elif activation == "relu":
            y = jnp.maximum(y, 0.0)
        o_ref[...] = y.astype(o_ref.dtype)


def pallas_linear(x, w, b, *, activation=None, tm=128, tn=256, tk=256):
    M, K = x.shape
    Kw, N = w.shape
    assert K == Kw

    TM, Mp = _pick_tile(M, tm, 8)
    TN, Np = _pick_tile(N, tn, 128)
    TK, Kp = _pick_tile(K, tk, 128)

    xp = _pad2d(x, Mp, Kp)
    wp = _pad2d(w, Kp, Np)
    bp = _pad2d(b.reshape(1, N), 1, Np)

    kernel = functools.partial(_linear_kernel, activation=activation)
    out = pl.pallas_call(
        kernel,
        out_shape=jax.ShapeDtypeStruct((Mp, Np), x.dtype),
        grid_spec=pltpu.PrefetchScalarGridSpec(
            num_scalar_prefetch=0,
            grid=(Mp // TM, Np // TN, Kp // TK),
            in_specs=[
                pl.BlockSpec((TM, TK), lambda i, j, k: (i, k)),
                pl.BlockSpec((TK, TN), lambda i, j, k: (k, j)),
                pl.BlockSpec((1, TN), lambda i, j, k: (0, j)),
            ],
            out_specs=pl.BlockSpec((TM, TN), lambda i, j, k: (i, j)),
            scratch_shapes=[pltpu.VMEM((TM, TN), jnp.float32)],
        ),
        compiler_params=pltpu.CompilerParams(
            dimension_semantics=("parallel", "parallel", "arbitrary")
        ),
    )(xp, wp, bp)
    return out[:M, :N]


# ----------------------------------------------------------------------------
# Kernel 2: tiled  out = log_softmax(x @ w + b)  (full class axis in one block,
# padded classes masked out of the softmax). grid = (M/TM, K/TK).
# ----------------------------------------------------------------------------
def _linear_logsoftmax_kernel(x_ref, w_ref, b_ref, o_ref, acc_ref, *, n_valid):
    k = pl.program_id(1)

    @pl.when(k == 0)
    def _():
        acc_ref[...] = jnp.zeros_like(acc_ref)

    acc_ref[...] += jnp.dot(
        x_ref[...], w_ref[...], preferred_element_type=jnp.float32
    )

    @pl.when(k == pl.num_programs(1) - 1)
    def _():
        logits = acc_ref[...] + b_ref[...]
        col = jax.lax.broadcasted_iota(jnp.int32, logits.shape, 1)
        valid = col < n_valid
        masked = jnp.where(valid, logits, jnp.float32(-1e30))
        m = jnp.max(masked, axis=-1, keepdims=True)
        e = jnp.where(valid, jnp.exp(masked - m), jnp.float32(0.0))
        lse = jnp.log(jnp.sum(e, axis=-1, keepdims=True)) + m
        o_ref[...] = (masked - lse).astype(o_ref.dtype)


def pallas_linear_logsoftmax(x, w, b, *, tm=128, tk=256):
    M, K = x.shape
    Kw, N = w.shape
    assert K == Kw

    TM, Mp = _pick_tile(M, tm, 8)
    TK, Kp = _pick_tile(K, tk, 128)
    Np = _round_up(N, 128)

    xp = _pad2d(x, Mp, Kp)
    wp = _pad2d(w, Kp, Np)
    bp = _pad2d(b.reshape(1, N), 1, Np)

    kernel = functools.partial(_linear_logsoftmax_kernel, n_valid=N)
    out = pl.pallas_call(
        kernel,
        out_shape=jax.ShapeDtypeStruct((Mp, Np), x.dtype),
        grid_spec=pltpu.PrefetchScalarGridSpec(
            num_scalar_prefetch=0,
            grid=(Mp // TM, Kp // TK),
            in_specs=[
                pl.BlockSpec((TM, TK), lambda i, k: (i, k)),
                pl.BlockSpec((TK, Np), lambda i, k: (k, 0)),
                pl.BlockSpec((1, Np), lambda i, k: (0, 0)),
            ],
            out_specs=pl.BlockSpec((TM, Np), lambda i, k: (i, 0)),
            scratch_shapes=[pltpu.VMEM((TM, Np), jnp.float32)],
        ),
        compiler_params=pltpu.CompilerParams(
            dimension_semantics=("parallel", "arbitrary")
        ),
    )(xp, wp, bp)
    return out[:M, :N]


# ----------------------------------------------------------------------------
# RDANN.forward
# ----------------------------------------------------------------------------
@jax.jit
def rdann_forward(x, params):
    b = x.shape[0]
    x = x.reshape(b, 1, -1)          # x.view(x.size(0), 1, -1)
    xf = x.reshape(b, -1)            # dense feature extractor consumes flat features

    # feature extractor
    z = pallas_linear(xf, params["w_feat"], params["b_feat"], activation="tanh")

    # label discriminator (log-probabilities, as expected by F.nll_loss)
    label = pallas_linear_logsoftmax(z, params["w_label"], params["b_label"])

    # grad_reverse: identity in the forward pass.
    # TODO(synk): gradient reversal (backward returns -grad) needs jax.custom_vjp,
    # it is not a forward-pass kernel.
    z1 = z

    # domain discriminator (regression head used with l1_loss in domain_fit)
    domain = pallas_linear(z1, params["w_dom"], params["b_dom"], activation=None)
    return label, domain


def _reference(x, params):
    b = x.shape[0]
    xf = x.reshape(b, -1)
    hi = jax.lax.Precision.HIGHEST
    z = jnp.tanh(jnp.dot(xf, params["w_feat"], precision=hi) + params["b_feat"])
    logits = jnp.dot(z, params["w_label"], precision=hi) + params["b_label"]
    label = jax.nn.log_softmax(logits, axis=-1)
    domain = jnp.dot(z, params["w_dom"], precision=hi) + params["b_dom"]
    return label, domain


if __name__ == "__main__":
    # Small shapes implied by the forward: batch=2, channels=4, spatial=16
    # -> per-sample feature length D = 64; hidden=32; 8 label classes; 1 domain output.
    B, C, S = 2, 4, 16
    D, H, NUM_CLASSES, DOM_OUT = C * S, 32, 8, 1

    key = jax.random.PRNGKey(0)
    kx, k1, k2, k3 = jax.random.split(key, 4)

    x = jax.random.normal(kx, (B, C, S), dtype=jnp.float32)
    params = {
        "w_feat": 0.1 * jax.random.normal(k1, (D, H), dtype=jnp.float32),
        "b_feat": jnp.zeros((H,), dtype=jnp.float32),
        "w_label": 0.1 * jax.random.normal(k2, (H, NUM_CLASSES), dtype=jnp.float32),
        "b_label": jnp.zeros((NUM_CLASSES,), dtype=jnp.float32),
        "w_dom": 0.1 * jax.random.normal(k3, (H, DOM_OUT), dtype=jnp.float32),
        "b_dom": jnp.zeros((DOM_OUT,), dtype=jnp.float32),
    }

    label, domain = rdann_forward(x, params)
    label, domain = jax.block_until_ready((label, domain))

    assert label.shape == (B, NUM_CLASSES) and label.dtype == jnp.float32
    assert domain.shape == (B, DOM_OUT) and domain.dtype == jnp.float32

    label_ref, domain_ref = _reference(x, params)
    assert jnp.allclose(label, label_ref, rtol=2e-2, atol=2e-2)
    assert jnp.allclose(domain, domain_ref, rtol=2e-2, atol=2e-2)
    # log-probabilities sum to 1 after exp
    assert jnp.allclose(jnp.sum(jnp.exp(label), axis=-1), 1.0, atol=1e-3)

    print("KERNEL_OK")
</pallas_src>

<mosaic_0001>
module attributes {stable_mosaic.version = 11 : i64} {
  func.func @_linear_kernel(%arg0: i32, %arg1: i32, %arg2: i32, %arg3: memref<8x128xf32, #tpu.memory_space<vmem>>, %arg4: memref<128x128xf32, #tpu.memory_space<vmem>>, %arg5: memref<1x128xf32, #tpu.memory_space<vmem>>, %arg6: memref<8x128xf32, #tpu.memory_space<vmem>>, %arg7: memref<8x128xf32, #tpu.memory_space<vmem>>) attributes {dimension_semantics = [#tpu.dimension_semantics<parallel>, #tpu.dimension_semantics<parallel>, #tpu.dimension_semantics<arbitrary>], iteration_bounds = array<i64: 1, 1, 1>, scalar_prefetch = 0 : i64, scratch_operands = 1 : i64, tpu.core_type = #tpu.core_type<tc>, window_params = [{transform_indices = @transform_0, window_bounds = array<i64: 8, 128>}, {transform_indices = @transform_1, window_bounds = array<i64: 128, 128>}, {transform_indices = @transform_2, window_bounds = array<i64: 1, 128>}, {transform_indices = @transform_3, window_bounds = array<i64: 8, 128>}]} {
    %c0_i32 = arith.constant 0 : i32
    %0 = arith.cmpi eq, %arg2, %c0_i32 : i32
    %1 = arith.extui %0 : i1 to i32
    %c0_i32_0 = arith.constant 0 : i32
    %2 = arith.cmpi ne, %1, %c0_i32_0 : i32
    scf.if %2 {
      %cst_10 = arith.constant 0.000000e+00 : f32
      %12 = vector.broadcast %cst_10 : f32 to vector<8x128xf32>
      %c0_11 = arith.constant 0 : index
      %c0_12 = arith.constant 0 : index
      %13 = vector.load %arg7[%c0_11, %c0_12] : memref<8x128xf32, #tpu.memory_space<vmem>>, vector<8x128xf32>
      tpu.vector_store %arg7[%c0_11, %c0_12], %12 {strides = array<i32>} : memref<8x128xf32, #tpu.memory_space<vmem>>, vector<8x128xf32>,
    } else {
    }
    %c0 = arith.constant 0 : index
    %c0_1 = arith.constant 0 : index
    %3 = vector.load %arg7[%c0, %c0_1] : memref<8x128xf32, #tpu.memory_space<vmem>>, vector<8x128xf32>
    %c0_2 = arith.constant 0 : index
    %c0_3 = arith.constant 0 : index
    %4 = vector.load %arg3[%c0_2, %c0_3] : memref<8x128xf32, #tpu.memory_space<vmem>>, vector<8x128xf32>
    %c0_4 = arith.constant 0 : index
    %c0_5 = arith.constant 0 : index
    %5 = vector.load %arg4[%c0_4, %c0_5] : memref<128x128xf32, #tpu.memory_space<vmem>>, vector<128x128xf32>
    %cst = arith.constant dense<0.000000e+00> : vector<8x128xf32>
    %6 = tpu.matmul %4, %5, %cst {dimension_numbers = #tpu.dot_dimension_numbers<[1], [0], [0], [1], [0, 0, 1, 1], [], []>} : vector<8x128xf32>, vector<128x128xf32>, vector<8x128xf32> -> vector<8x128xf32>
    %7 = arith.addf %3, %6 : vector<8x128xf32>
    %c0_6 = arith.constant 0 : index
    %c0_7 = arith.constant 0 : index
    %8 = vector.load %arg7[%c0_6, %c0_7] : memref<8x128xf32, #tpu.memory_space<vmem>>, vector<8x128xf32>
    tpu.vector_store %arg7[%c0_6, %c0_7], %7 {strides = array<i32>} : memref<8x128xf32, #tpu.memory_space<vmem>>, vector<8x128xf32>,
    %c0_i32_8 = arith.constant 0 : i32
    %9 = arith.cmpi eq, %arg2, %c0_i32_8 : i32
    %10 = arith.extui %9 : i1 to i32
    %c0_i32_9 = arith.constant 0 : i32
    %11 = arith.cmpi ne, %10, %c0_i32_9 : i32
    scf.if %11 {
      %c0_10 = arith.constant 0 : index
      %c0_11 = arith.constant 0 : index
      %12 = vector.load %arg7[%c0_10, %c0_11] : memref<8x128xf32, #tpu.memory_space<vmem>>, vector<8x128xf32>
      %c0_12 = arith.constant 0 : index
      %c0_13 = arith.constant 0 : index
      %13 = vector.load %arg5[%c0_12, %c0_13] : memref<1x128xf32, #tpu.memory_space<vmem>>, vector<1x128xf32>
      %14 = vector.broadcast %13 : vector<1x128xf32> to vector<8x128xf32>
      %15 = arith.addf %12, %14 : vector<8x128xf32>
      %16 = math.tanh %15 : vector<8x128xf32>
      %c0_14 = arith.constant 0 : index
      %c0_15 = arith.constant 0 : index
      %17 = vector.load %arg6[%c0_14, %c0_15] : memref<8x128xf32, #tpu.memory_space<vmem>>, vector<8x128xf32>
      tpu.vector_store %arg6[%c0_14, %c0_15], %16 {strides = array<i32>} : memref<8x128xf32, #tpu.memory_space<vmem>>, vector<8x128xf32>,
    } else {
    }
    return
  }
  func.func @transform_0(%arg0: i32, %arg1: i32, %arg2: i32) -> (i32, i32) {
    %c0_i32 = arith.constant 0 : i32
    return %arg0, %arg2 : i32, i32
  }
  func.func @transform_1(%arg0: i32, %arg1: i32, %arg2: i32) -> (i32, i32) {
    %c0_i32 = arith.constant 0 : i32
    return %arg2, %arg1 : i32, i32
  }
  func.func @transform_2(%arg0: i32, %arg1: i32, %arg2: i32) -> (i32, i32) {
    %c0_i32 = arith.constant 0 : i32
    %c0_i32_0 = arith.constant 0 : i32
    return %c0_i32, %arg1 : i32, i32
  }
  func.func @transform_3(%arg0: i32, %arg1: i32, %arg2: i32) -> (i32, i32) {
    %c0_i32 = arith.constant 0 : i32
    return %arg0, %arg1 : i32, i32
  }
}

module attributes {stable_mosaic.version = 11 : i64} {
  func.func @_linear_kernel(%arg0: i32, %arg1: i32, %arg2: i32, %arg3: memref<8x128xf32, #tpu.memory_space<vmem>>, %arg4: memref<128x128xf32, #tpu.memory_space<vmem>>, %arg5: memref<1x128xf32, #tpu.memory_space<vmem>>, %arg6: memref<8x128xf32, #tpu.memory_space<vmem>>, %arg7: memref<8x128xf32, #tpu.memory_space<vmem>>) attributes {dimension_semantics = [#tpu.dimension_semantics<parallel>, #tpu.dimension_semantics<parallel>, #tpu.dimension_semantics<arbitrary>], iteration_bounds = array<i64: 1, 1, 1>, scalar_prefetch = 0 : i64, scratch_operands = 1 : i64, tpu.core_type = #tpu.core_type<tc>, window_params = [{transform_indices = @transform_0, window_bounds = array<i64: 8, 128>}, {transform_indices = @transform_1, window_bounds = array<i64: 128, 128>}, {transform_indices = @transform_2, window_bounds = array<i64: 1, 128>}, {transform_indices = @transform_3, window_bounds = array<i64: 8, 128>}]} {
    %c0_i32 = arith.constant 0 : i32
    %0 = arith.cmpi eq, %arg2, %c0_i32 : i32
    %1 = arith.extui %0 : i1 to i32
    %c0_i32_0 = arith.constant 0 : i32
    %2 = arith.cmpi ne, %1, %c0_i32_0 : i32
    scf.if %2 {
      %cst_10 = arith.constant 0.000000e+00 : f32
      %12 = vector.broadcast %cst_10 : f32 to vector<8x128xf32>
      %c0_11 = arith.constant 0 : index
      %c0_12 = arith.constant 0 : index
      %13 = vector.load %arg7[%c0_11, %c0_12] : memref<8x128xf32, #tpu.memory_space<vmem>>, vector<8x128xf32>
      tpu.vector_store %arg7[%c0_11, %c0_12], %12 {strides = array<i32>} : memref<8x128xf32, #tpu.memory_space<vmem>>, vector<8x128xf32>,
    } else {
    }
    %c0 = arith.constant 0 : index
    %c0_1 = arith.constant 0 : index
    %3 = vector.load %arg7[%c0, %c0_1] : memref<8x128xf32, #tpu.memory_space<vmem>>, vector<8x128xf32>
    %c0_2 = arith.constant 0 : index
    %c0_3 = arith.constant 0 : index
    %4 = vector.load %arg3[%c0_2, %c0_3] : memref<8x128xf32, #tpu.memory_space<vmem>>, vector<8x128xf32>
    %c0_4 = arith.constant 0 : index
    %c0_5 = arith.constant 0 : index
    %5 = vector.load %arg4[%c0_4, %c0_5] : memref<128x128xf32, #tpu.memory_space<vmem>>, vector<128x128xf32>
    %cst = arith.constant dense<0.000000e+00> : vector<8x128xf32>
    %6 = tpu.matmul %4, %5, %cst {dimension_numbers = #tpu.dot_dimension_numbers<[1], [0], [0], [1], [0, 0, 1, 1], [], []>} : vector<8x128xf32>, vector<128x128xf32>, vector<8x128xf32> -> vector<8x128xf32>
    %7 = arith.addf %3, %6 : vector<8x128xf32>
    %c0_6 = arith.constant 0 : index
    %c0_7 = arith.constant 0 : index
    %8 = vector.load %arg7[%c0_6, %c0_7] : memref<8x128xf32, #tpu.memory_space<vmem>>, vector<8x128xf32>
    tpu.vector_store %arg7[%c0_6, %c0_7], %7 {strides = array<i32>} : memref<8x128xf32, #tpu.memory_space<vmem>>, vector<8x128xf32>,
    %c0_i32_8 = arith.constant 0 : i32
    %9 = arith.cmpi eq, %arg2, %c0_i32_8 : i32
    %10 = arith.extui %9 : i1 to i32
    %c0_i32_9 = arith.constant 0 : i32
    %11 = arith.cmpi ne, %10, %c0_i32_9 : i32
    scf.if %11 {
      %c0_10 = arith.constant 0 : index
      %c0_11 = arith.constant 0 : index
      %12 = vector.load %arg7[%c0_10, %c0_11] : memref<8x128xf32, #tpu.memory_space<vmem>>, vector<8x128xf32>
      %c0_12 = arith.constant 0 : index
      %c0_13 = arith.constant 0 : index
      %13 = vector.load %arg5[%c0_12, %c0_13] : memref<1x128xf32, #tpu.memory_space<vmem>>, vector<1x128xf32>
      %14 = vector.broadcast %13 : vector<1x128xf32> to vector<8x128xf32>
      %15 = arith.addf %12, %14 : vector<8x128xf32>
      %c0_14 = arith.constant 0 : index
      %c0_15 = arith.constant 0 : index
      %16 = vector.load %arg6[%c0_14, %c0_15] : memref<8x128xf32, #tpu.memory_space<vmem>>, vector<8x128xf32>
      tpu.vector_store %arg6[%c0_14, %c0_15], %15 {strides = array<i32>} : memref<8x128xf32, #tpu.memory_space<vmem>>, vector<8x128xf32>,
    } else {
    }
    return
  }
  func.func @transform_0(%arg0: i32, %arg1: i32, %arg2: i32) -> (i32, i32) {
    %c0_i32 = arith.constant 0 : i32
    return %arg0, %arg2 : i32, i32
  }
  func.func @transform_1(%arg0: i32, %arg1: i32, %arg2: i32) -> (i32, i32) {
    %c0_i32 = arith.constant 0 : i32
    return %arg2, %arg1 : i32, i32
  }
  func.func @transform_2(%arg0: i32, %arg1: i32, %arg2: i32) -> (i32, i32) {
    %c0_i32 = arith.constant 0 : i32
    %c0_i32_0 = arith.constant 0 : i32
    return %c0_i32, %arg1 : i32, i32
  }
  func.func @transform_3(%arg0: i32, %arg1: i32, %arg2: i32) -> (i32, i32) {
    %c0_i32 = arith.constant 0 : i32
    return %arg0, %arg1 : i32, i32
  }
}

module attributes {stable_mosaic.version = 11 : i64} {
  func.func @_linear_logsoftmax_kernel(%arg0: i32, %arg1: i32, %arg2: memref<8x128xf32, #tpu.memory_space<vmem>>, %arg3: memref<128x128xf32, #tpu.memory_space<vmem>>, %arg4: memref<1x128xf32, #tpu.memory_space<vmem>>, %arg5: memref<8x128xf32, #tpu.memory_space<vmem>>, %arg6: memref<8x128xf32, #tpu.memory_space<vmem>>) attributes {dimension_semantics = [#tpu.dimension_semantics<parallel>, #tpu.dimension_semantics<arbitrary>], iteration_bounds = array<i64: 1, 1>, scalar_prefetch = 0 : i64, scratch_operands = 1 : i64, tpu.core_type = #tpu.core_type<tc>, window_params = [{transform_indices = @transform_0, window_bounds = array<i64: 8, 128>}, {transform_indices = @transform_1, window_bounds = array<i64: 128, 128>}, {pipeline_mode = #tpu.pipeline_mode<synchronous>, transform_indices = @transform_2, window_bounds = array<i64: 1, 128>}, {transform_indices = @transform_3, window_bounds = array<i64: 8, 128>}]} {
    %c0_i32 = arith.constant 0 : i32
    %0 = arith.cmpi eq, %arg1, %c0_i32 : i32
    %1 = arith.extui %0 : i1 to i32
    %c0_i32_0 = arith.constant 0 : i32
    %2 = arith.cmpi ne, %1, %c0_i32_0 : i32
    scf.if %2 {
      %cst_10 = arith.constant 0.000000e+00 : f32
      %12 = vector.broadcast %cst_10 : f32 to vector<8x128xf32>
      %c0_11 = arith.constant 0 : index
      %c0_12 = arith.constant 0 : index
      %13 = vector.load %arg6[%c0_11, %c0_12] : memref<8x128xf32, #tpu.memory_space<vmem>>, vector<8x128xf32>
      tpu.vector_store %arg6[%c0_11, %c0_12], %12 {strides = array<i32>} : memref<8x128xf32, #tpu.memory_space<vmem>>, vector<8x128xf32>,
    } else {
    }
    %c0 = arith.constant 0 : index
    %c0_1 = arith.constant 0 : index
    %3 = vector.load %arg6[%c0, %c0_1] : memref<8x128xf32, #tpu.memory_space<vmem>>, vector<8x128xf32>
    %c0_2 = arith.constant 0 : index
    %c0_3 = arith.constant 0 : index
    %4 = vector.load %arg2[%c0_2, %c0_3] : memref<8x128xf32, #tpu.memory_space<vmem>>, vector<8x128xf32>
    %c0_4 = arith.constant 0 : index
    %c0_5 = arith.constant 0 : index
    %5 = vector.load %arg3[%c0_4, %c0_5] : memref<128x128xf32, #tpu.memory_space<vmem>>, vector<128x128xf32>
    %cst = arith.constant dense<0.000000e+00> : vector<8x128xf32>
    %6 = tpu.matmul %4, %5, %cst {dimension_numbers = #tpu.dot_dimension_numbers<[1], [0], [0], [1], [0, 0, 1, 1], [], []>} : vector<8x128xf32>, vector<128x128xf32>, vector<8x128xf32> -> vector<8x128xf32>
    %7 = arith.addf %3, %6 : vector<8x128xf32>
    %c0_6 = arith.constant 0 : index
    %c0_7 = arith.constant 0 : index
    %8 = vector.load %arg6[%c0_6, %c0_7] : memref<8x128xf32, #tpu.memory_space<vmem>>, vector<8x128xf32>
    tpu.vector_store %arg6[%c0_6, %c0_7], %7 {strides = array<i32>} : memref<8x128xf32, #tpu.memory_space<vmem>>, vector<8x128xf32>,
    %c0_i32_8 = arith.constant 0 : i32
    %9 = arith.cmpi eq, %arg1, %c0_i32_8 : i32
    %10 = arith.extui %9 : i1 to i32
    %c0_i32_9 = arith.constant 0 : i32
    %11 = arith.cmpi ne, %10, %c0_i32_9 : i32
    scf.if %11 {
      %c0_10 = arith.constant 0 : index
      %c0_11 = arith.constant 0 : index
      %12 = vector.load %arg6[%c0_10, %c0_11] : memref<8x128xf32, #tpu.memory_space<vmem>>, vector<8x128xf32>
      %c0_12 = arith.constant 0 : index
      %c0_13 = arith.constant 0 : index
      %13 = vector.load %arg4[%c0_12, %c0_13] : memref<1x128xf32, #tpu.memory_space<vmem>>, vector<1x128xf32>
      %14 = vector.broadcast %13 : vector<1x128xf32> to vector<8x128xf32>
      %15 = arith.addf %12, %14 : vector<8x128xf32>
      %16 = tpu.iota {dimensions = array<i32: 1>} : vector<8x128xi32>
      %c8_i32 = arith.constant 8 : i32
      %17 = vector.broadcast %c8_i32 : i32 to vector<8x128xi32>
      %18 = arith.cmpi slt, %16, %17 : vector<8x128xi32>
      %cst_14 = arith.constant -1.000000e+30 : f32
      %19 = vector.broadcast %cst_14 : f32 to vector<8x128xf32>
      %20 = arith.select %18, %15, %19 : vector<8x128xi1>, vector<8x128xf32>
      %cst_15 = arith.constant dense<0xFF800000> : vector<8xf32>
      %21 = vector.multi_reduction <maximumf>, %20, %cst_15 [1] : vector<8x128xf32> to vector<8xf32>
      %22 = vector.shape_cast %21 : vector<8xf32> to vector<8x1xf32>
      %23 = vector.broadcast %22 : vector<8x1xf32> to vector<8x128xf32>
      %24 = arith.subf %20, %23 : vector<8x128xf32>
      %25 = math.exp %24 : vector<8x128xf32>
      %cst_16 = arith.constant 0.000000e+00 : f32
      %26 = vector.broadcast %cst_16 : f32 to vector<8x128xf32>
      %27 = arith.select %18, %25, %26 : vector<8x128xi1>, vector<8x128xf32>
      %cst_17 = arith.constant dense<0.000000e+00> : vector<8xf32>
      %28 = vector.multi_reduction <add>, %27, %cst_17 [1] : vector<8x128xf32> to vector<8xf32>
      %29 = vector.shape_cast %28 : vector<8xf32> to vector<8x1xf32>
      %30 = math.log %29 : vector<8x1xf32>
      %31 = arith.addf %30, %22 : vector<8x1xf32>
      %32 = vector.broadcast %31 : vector<8x1xf32> to vector<8x128xf32>
      %33 = arith.subf %20, %32 : vector<8x128xf32>
      %c0_18 = arith.constant 0 : index
      %c0_19 = arith.constant 0 : index
      %34 = vector.load %arg5[%c0_18, %c0_19] : memref<8x128xf32, #tpu.memory_space<vmem>>, vector<8x128xf32>
      tpu.vector_store %arg5[%c0_18, %c0_19], %33 {strides = array<i32>} : memref<8x128xf32, #tpu.memory_space<vmem>>, vector<8x128xf32>,
    } else {
    }
    return
  }
  func.func @transform_0(%arg0: i32, %arg1: i32) -> (i32, i32) {
    %c0_i32 = arith.constant 0 : i32
    return %arg0, %arg1 : i32, i32
  }
  func.func @transform_1(%arg0: i32, %arg1: i32) -> (i32, i32) {
    %c0_i32 = arith.constant 0 : i32
    %c0_i32_0 = arith.constant 0 : i32
    return %arg1, %c0_i32 : i32, i32
  }
  func.func @transform_2(%arg0: i32, %arg1: i32) -> (i32, i32) {
    %c0_i32 = arith.constant 0 : i32
    %c0_i32_0 = arith.constant 0 : i32
    %c0_i32_1 = arith.constant 0 : i32
    return %c0_i32, %c0_i32_0 : i32, i32
  }
  func.func @transform_3(%arg0: i32, %arg1: i32) -> (i32, i32) {
    %c0_i32 = arith.constant 0 : i32
    %c0_i32_0 = arith.constant 0 : i32
    return %arg0, %c0_i32 : i32, i32
  }
}

</mosaic_0001>

<bundles_post_ra>
// kernel: rdann_forward.5
= control target key start
LH: loop header
LB: loop body
LE: loop exit
PB: predicated region body
PF: predicated region fallthrough
CT: control target
= control target key end

     0   :  { %v181_v0 = vmov 0.0   ;;  %vm182_vm0 = vmmov 0   ;;  %s260_s1 = inlined_call_operand.vmem [shape: f32[128,128], index: 1, kind: input, shape index: {}]   ;;  %s261_s0 = inlined_call_operand.vmem [shape: f32[8,128], index: 0, kind: input, shape index: {}]   ;;  %s262_s2 = inlined_call_operand.vmem [shape: f32[1,128], index: 2, kind: input, shape index: {}]   ;;  %s263_s3 = inlined_call_operand.vmem [shape: f32[8,128], index: 3, kind: output, shape index: {}]  }
   0x1   :  { %144 = vmatprep.subr.mxu0 %v181_v0  ;;  %v36_v1 = vld [vmem:[%s260_s1 + $0x78] sm:$0xff]  ;;  %v35_v2 = vld [vmem:[%s260_s1 + $0x70] sm:$0xff]  ;;  %176 = vmatprep.mubr.msk.f32.mxu0 %vm182_vm0, %v181_v0  ;;  %v34_v3 = vld [vmem:[%s260_s1 + $0x68] sm:$0xff] }
   0x2   :  { %145 = vmatpush3.msra.mxu0 %v36_v1  ;;  %v33_v4 = vld [vmem:[%s260_s1 + $0x60] sm:$0xff]  ;;  %v32_v5 = vld [vmem:[%s260_s1 + $0x58] sm:$0xff]  ;;  %v31_v6 = vld [vmem:[%s260_s1 + $0x50] sm:$0xff] }
   0x3   :  { %146 = vmatprep.subr.mxu0 %v181_v0  ;;  %v30_v7 = vld [vmem:[%s260_s1 + $0x48] sm:$0xff]  ;;  %v29_v8 = vld [vmem:[%s260_s1 + $0x40] sm:$0xff]  ;;  %v28_v9 = vld [vmem:[%s260_s1 + $0x38] sm:$0xff] }
   0x4   :  { %147 = vmatpush3.msra.mxu0 %v35_v2  ;;  %v27_v10 = vld [vmem:[%s260_s1 + $0x30] sm:$0xff]  ;;  %v26_v11 = vld [vmem:[%s260_s1 + $0x28] sm:$0xff]  ;;  %v25_v12 = vld [vmem:[%s260_s1 + $0x20] sm:$0xff] }
   0x5   :  { %148 = vmatprep.subr.mxu0 %v181_v0  ;;  %v24_v13 = vld [vmem:[%s260_s1 + $0x18] sm:$0xff]  ;;  %v23_v14 = vld [vmem:[%s260_s1 + $0x10] sm:$0xff]  ;;  %v22_v15 = vld [vmem:[%s260_s1 + $0x8] sm:$0xff] }
   0x6   :  { %149 = vmatpush3.msra.mxu0 %v34_v3  ;;  %v21_v16 = vld [vmem:[%s260_s1] sm:$0xff] }
   0x7   :  { %150 = vmatprep.subr.mxu0 %v181_v0  ;;  %v20_v17 = vld [vmem:[%s261_s0] sm:$0xff] }
   0x8   :  { %151 = vmatpush3.msra.mxu0 %v33_v4  ;;  %v126_v18 = vld [vmem:[%s262_s2] ss:$0 sm:$0xff] }
   0x9   :  { %152 = vmatprep.subr.mxu0 %v181_v0 }
   0xa   :  { %153 = vmatpush3.msra.mxu0 %v32_v5 }
   0xb   :  { %154 = vmatprep.subr.mxu0 %v181_v0 }
   0xc   :  { %155 = vmatpush3.msra.mxu0 %v31_v6 }
   0xd   :  { %156 = vmatprep.subr.mxu0 %v181_v0 }
   0xe   :  { %157 = vmatpush3.msra.mxu0 %v30_v7 }
   0xf   :  { %158 = vmatprep.subr.mxu0 %v181_v0 }
  0x10   :  { %159 = vmatpush3.msra.mxu0 %v29_v8 }
  0x11   :  { %160 = vmatprep.subr.mxu0 %v181_v0 }
  0x12   :  { %161 = vmatpush3.msra.mxu0 %v28_v9 }
  0x13   :  { %162 = vmatprep.subr.mxu0 %v181_v0 }
  0x14   :  { %163 = vmatpush3.msra.mxu0 %v27_v10 }
  0x15   :  { %164 = vmatprep.subr.mxu0 %v181_v0 }
  0x16   :  { %165 = vmatpush3.msra.mxu0 %v26_v11 }
  0x17   :  { %166 = vmatprep.subr.mxu0 %v181_v0 }
  0x18   :  { %167 = vmatpush3.msra.mxu0 %v25_v12 }
  0x19   :  { %168 = vmatprep.subr.mxu0 %v181_v0 }
  0x1a   :  { %169 = vmatpush3.msra.mxu0 %v24_v13 }
  0x1b   :  { %170 = vmatprep.subr.mxu0 %v181_v0 }
  0x1c   :  { %171 = vmatpush3.msra.mxu0 %v23_v14 }
  0x1d   :  { %172 = vmatprep.subr.mxu0 %v181_v0 }
  0x1e   :  { %173 = vmatpush3.msra.mxu0 %v22_v15 }
  0x1f   :  { %174 = vmatprep.subr.mxu0 %v181_v0 }
  0x20   :  { %175 = vmatpush3.msra.mxu0 %v21_v16 }
  0x21   :  { %177 = vmatmul.mubr.f32.vlgmr.msra.gmra.mxu0 %v20_v17 }
  0xe1   :  { %v103_v19 = vpop.f32.mrf.mxu0 }
  0xe2   :  { %v120_v20 = vadd.f32 %v126_v18, %v103_v19 }
  0xe3   :  { %v178_v21 = vpop.f32.mrf.mxu0 }
  0xe4   :  { %121 = vst [vmem:[%s263_s3] sm:$0xff] %v120_v20 }

// kernel: rdann_forward.3
= control target key start
LH: loop header
LB: loop body
LE: loop exit
PB: predicated region body
PF: predicated region fallthrough
CT: control target
= control target key end

     0   :  { %v184_v0 = vmov 0.0   ;;  %vm185_vm0 = vmmov 0   ;;  %s263_s1 = inlined_call_operand.vmem [shape: f32[128,128], index: 1, kind: input, shape index: {}]   ;;  %s264_s0 = inlined_call_operand.vmem [shape: f32[8,128], index: 0, kind: input, shape index: {}]   ;;  %s265_s2 = inlined_call_operand.vmem [shape: f32[1,128], index: 2, kind: input, shape index: {}]   ;;  %s266_s3 = inlined_call_operand.vmem [shape: f32[8,128], index: 3, kind: output, shape index: {}]  }
   0x1   :  { %145 = vmatprep.subr.mxu0 %v184_v0  ;;  %v36_v1 = vld [vmem:[%s263_s1 + $0x78] sm:$0xff]  ;;  %v35_v2 = vld [vmem:[%s263_s1 + $0x70] sm:$0xff]  ;;  %177 = vmatprep.mubr.msk.f32.mxu0 %vm185_vm0, %v184_v0  ;;  %v34_v3 = vld [vmem:[%s263_s1 + $0x68] sm:$0xff] }
   0x2   :  { %146 = vmatpush3.msra.mxu0 %v36_v1  ;;  %v33_v4 = vld [vmem:[%s263_s1 + $0x60] sm:$0xff]  ;;  %v32_v5 = vld [vmem:[%s263_s1 + $0x58] sm:$0xff]  ;;  %v31_v6 = vld [vmem:[%s263_s1 + $0x50] sm:$0xff] }
   0x3   :  { %147 = vmatprep.subr.mxu0 %v184_v0  ;;  %v30_v7 = vld [vmem:[%s263_s1 + $0x48] sm:$0xff]  ;;  %v29_v8 = vld [vmem:[%s263_s1 + $0x40] sm:$0xff]  ;;  %v28_v9 = vld [vmem:[%s263_s1 + $0x38] sm:$0xff] }
   0x4   :  { %148 = vmatpush3.msra.mxu0 %v35_v2  ;;  %v27_v10 = vld [vmem:[%s263_s1 + $0x30] sm:$0xff]  ;;  %v26_v11 = vld [vmem:[%s263_s1 + $0x28] sm:$0xff]  ;;  %v25_v12 = vld [vmem:[%s263_s1 + $0x20] sm:$0xff] }
   0x5   :  { %149 = vmatprep.subr.mxu0 %v184_v0  ;;  %v24_v13 = vld [vmem:[%s263_s1 + $0x18] sm:$0xff]  ;;  %v23_v14 = vld [vmem:[%s263_s1 + $0x10] sm:$0xff]  ;;  %v22_v15 = vld [vmem:[%s263_s1 + $0x8] sm:$0xff] }
   0x6   :  { %150 = vmatpush3.msra.mxu0 %v34_v3  ;;  %v21_v16 = vld [vmem:[%s263_s1] sm:$0xff] }
   0x7   :  { %151 = vmatprep.subr.mxu0 %v184_v0  ;;  %v20_v17 = vld [vmem:[%s264_s0] sm:$0xff] }
   0x8   :  { %152 = vmatpush3.msra.mxu0 %v33_v4  ;;  %v127_v18 = vld [vmem:[%s265_s2] ss:$0 sm:$0xff] }
   0x9   :  { %153 = vmatprep.subr.mxu0 %v184_v0 }
   0xa   :  { %154 = vmatpush3.msra.mxu0 %v32_v5 }
   0xb   :  { %155 = vmatprep.subr.mxu0 %v184_v0 }
   0xc   :  { %156 = vmatpush3.msra.mxu0 %v31_v6 }
   0xd   :  { %157 = vmatprep.subr.mxu0 %v184_v0 }
   0xe   :  { %158 = vmatpush3.msra.mxu0 %v30_v7 }
   0xf   :  { %159 = vmatprep.subr.mxu0 %v184_v0 }
  0x10   :  { %160 = vmatpush3.msra.mxu0 %v29_v8 }
  0x11   :  { %161 = vmatprep.subr.mxu0 %v184_v0 }
  0x12   :  { %162 = vmatpush3.msra.mxu0 %v28_v9 }
  0x13   :  { %163 = vmatprep.subr.mxu0 %v184_v0 }
  0x14   :  { %164 = vmatpush3.msra.mxu0 %v27_v10 }
  0x15   :  { %165 = vmatprep.subr.mxu0 %v184_v0 }
  0x16   :  { %166 = vmatpush3.msra.mxu0 %v26_v11 }
  0x17   :  { %167 = vmatprep.subr.mxu0 %v184_v0 }
  0x18   :  { %168 = vmatpush3.msra.mxu0 %v25_v12 }
  0x19   :  { %169 = vmatprep.subr.mxu0 %v184_v0 }
  0x1a   :  { %170 = vmatpush3.msra.mxu0 %v24_v13 }
  0x1b   :  { %171 = vmatprep.subr.mxu0 %v184_v0 }
  0x1c   :  { %172 = vmatpush3.msra.mxu0 %v23_v14 }
  0x1d   :  { %173 = vmatprep.subr.mxu0 %v184_v0 }
  0x1e   :  { %174 = vmatpush3.msra.mxu0 %v22_v15 }
  0x1f   :  { %175 = vmatprep.subr.mxu0 %v184_v0 }
  0x20   :  { %176 = vmatpush3.msra.mxu0 %v21_v16 }
  0x21   :  { %178 = vmatmul.mubr.f32.vlgmr.msra.gmra.mxu0 %v20_v17 }
  0xe1   :  { %v103_v19 = vpop.f32.mrf.mxu0 }
  0xe2   :  { %v120_v20 = vadd.f32 %v127_v18, %v103_v19 }
  0xe3   :  { %v179_v21 = vpop.f32.mrf.mxu0 }
  0xe4   :  { %182 = vtanh.f32 %v120_v20 }
  0xf1   :  { %v183_v22 = vpop.eup %182 }
  0xf2   :  { %122 = vst [vmem:[%s266_s3] sm:$0xff] %v183_v22 }

// kernel: rdann_forward.4
= control target key start
LH: loop header
LB: loop body
LE: loop exit
PB: predicated region body
PF: predicated region fallthrough
CT: control target
= control target key end

     0   :  { %v201_v0 = vmov 0.0   ;;  %vm202_vm0 = vmmov 0   ;;  %v121_v18 = vlaneseq  ;;  %s280_s1 = inlined_call_operand.vmem [shape: f32[128,128], index: 1, kind: input, shape index: {}]   ;;  %s281_s0 = inlined_call_operand.vmem [shape: f32[8,128], index: 0, kind: input, shape index: {}]   ;;  %s282_s2 = inlined_call_operand.vmem [shape: f32[1,128], index: 2, kind: input, shape index: {}]   ;;  %s283_s3 = inlined_call_operand.vmem [shape: f32[8,128], index: 3, kind: output, shape index: {}]  }
   0x1   :  { %160 = vmatprep.subr.mxu0 %v201_v0  ;;  %v36_v1 = vld [vmem:[%s280_s1 + $0x78] sm:$0xff]  ;;  %v35_v2 = vld [vmem:[%s280_s1 + $0x70] sm:$0xff]  ;;  %192 = vmatprep.mubr.msk.f32.mxu0 %vm202_vm0, %v201_v0  ;;  %v34_v3 = vld [vmem:[%s280_s1 + $0x68] sm:$0xff] }
   0x2   :  { %161 = vmatpush3.msra.mxu0 %v36_v1  ;;  %v33_v4 = vld [vmem:[%s280_s1 + $0x60] sm:$0xff]  ;;  %v32_v5 = vld [vmem:[%s280_s1 + $0x58] sm:$0xff]  ;;  %v31_v6 = vld [vmem:[%s280_s1 + $0x50] sm:$0xff]  ;;  %v122_v19 = vand.u32 127, %v121_v18 }
   0x3   :  { %162 = vmatprep.subr.mxu0 %v201_v0  ;;  %v30_v7 = vld [vmem:[%s280_s1 + $0x48] sm:$0xff]  ;;  %v29_v8 = vld [vmem:[%s280_s1 + $0x40] sm:$0xff]  ;;  %v28_v9 = vld [vmem:[%s280_s1 + $0x38] sm:$0xff] }
   0x4   :  { %163 = vmatpush3.msra.mxu0 %v35_v2  ;;  %v27_v10 = vld [vmem:[%s280_s1 + $0x30] sm:$0xff]  ;;  %v26_v11 = vld [vmem:[%s280_s1 + $0x28] sm:$0xff]  ;;  %v25_v12 = vld [vmem:[%s280_s1 + $0x20] sm:$0xff]  ;;  %vm123_vm1 = vcmp.lt.s32.totalorder %v122_v19, 8 }
   0x5   :  { %164 = vmatprep.subr.mxu0 %v201_v0  ;;  %v24_v13 = vld [vmem:[%s280_s1 + $0x18] sm:$0xff]  ;;  %v23_v14 = vld [vmem:[%s280_s1 + $0x10] sm:$0xff]  ;;  %v22_v15 = vld [vmem:[%s280_s1 + $0x8] sm:$0xff] }
   0x6   :  { %165 = vmatpush3.msra.mxu0 %v34_v3  ;;  %v21_v16 = vld [vmem:[%s280_s1] sm:$0xff] }
   0x7   :  { %166 = vmatprep.subr.mxu0 %v201_v0  ;;  %v20_v17 = vld [vmem:[%s281_s0] sm:$0xff] }
   0x8   :  { %167 = vmatpush3.msra.mxu0 %v33_v4  ;;  %v142_v20 = vld [vmem:[%s282_s2] ss:$0 sm:$0xff] }
   0x9   :  { %168 = vmatprep.subr.mxu0 %v201_v0 }
   0xa   :  { %169 = vmatpush3.msra.mxu0 %v32_v5 }
   0xb   :  { %170 = vmatprep.subr.mxu0 %v201_v0 }
   0xc   :  { %171 = vmatpush3.msra.mxu0 %v31_v6 }
   0xd   :  { %172 = vmatprep.subr.mxu0 %v201_v0 }
   0xe   :  { %173 = vmatpush3.msra.mxu0 %v30_v7 }
   0xf   :  { %174 = vmatprep.subr.mxu0 %v201_v0 }
  0x10   :  { %175 = vmatpush3.msra.mxu0 %v29_v8 }
  0x11   :  { %176 = vmatprep.subr.mxu0 %v201_v0 }
  0x12   :  { %177 = vmatpush3.msra.mxu0 %v28_v9 }
  0x13   :  { %178 = vmatprep.subr.mxu0 %v201_v0 }
  0x14   :  { %179 = vmatpush3.msra.mxu0 %v27_v10 }
  0x15   :  { %180 = vmatprep.subr.mxu0 %v201_v0 }
  0x16   :  { %181 = vmatpush3.msra.mxu0 %v26_v11 }
  0x17   :  { %182 = vmatprep.subr.mxu0 %v201_v0 }
  0x18   :  { %183 = vmatpush3.msra.mxu0 %v25_v12 }
  0x19   :  { %184 = vmatprep.subr.mxu0 %v201_v0 }
  0x1a   :  { %185 = vmatpush3.msra.mxu0 %v24_v13 }
  0x1b   :  { %186 = vmatprep.subr.mxu0 %v201_v0 }
  0x1c   :  { %187 = vmatpush3.msra.mxu0 %v23_v14 }
  0x1d   :  { %188 = vmatprep.subr.mxu0 %v201_v0 }
  0x1e   :  { %189 = vmatpush3.msra.mxu0 %v22_v15 }
  0x1f   :  { %190 = vmatprep.subr.mxu0 %v201_v0 }
  0x20   :  { %191 = vmatpush3.msra.mxu0 %v21_v16 }
  0x21   :  { %193 = vmatmul.mubr.f32.vlgmr.msra.gmra.mxu0 %v20_v17 }
  0xe1   :  { %v103_v21 = vpop.f32.mrf.mxu0 }
  0xe2   :  { %v120_v22 = vadd.f32 %v142_v20, %v103_v21 }
  0xe3   :  { %v194_v23 = vpop.f32.mrf.mxu0 }
  0xe4   :  { %v124_v24 = vsel %vm123_vm1, %v120_v22, -1e+30 }
  0xe5   :  { %125 = vmax.xlane.f32.xlu0 %v124_v24 }
 0x16e   :  { %v126_v25 = vpop.xlane.xlu0 %125 }
 0x16f   :  { %v127_v26 = vsub.f32 %v124_v24, %v126_v25 }
 0x171   :  { %v128_v27 = vmul.f32 1.442695, %v127_v26 }
 0x173   :  { %197 = vpow2.f32 %v128_v27 }
 0x180   :  { %v198_v28 = vpop.eup %197 }
 0x181   :  { %v130_v29 = vsel %vm123_vm1, %v198_v28, 0.0 }
 0x182   :  { %131 = vadd.xlane.f32.xlu0 %v130_v29 }
 0x20b   :  { %v132_v30 = vpop.xlane.xlu0 %131 }
 0x20c   :  { %199 = vlog2.f32 %v132_v30 }
 0x219   :  { %v200_v31 = vpop.eup %199 }
 0x21a   :  { %v134_v32 = vmul.f32 0.6931472, %v200_v31 }
 0x21c   :  { %v135_v33 = vadd.f32 %v134_v32, %v126_v25 }
 0x21e   :  { %v136_v34 = vsub.f32 %v124_v24, %v135_v33 }
 0x220   :  { %137 = vst [vmem:[%s283_s3] sm:$0xff] %v136_v34 }

</bundles_post_ra>
